<compile_context>
chip_gen: v7x
topology: tpu7x:2x2x1
jax: 0.10.0
libtpu: 0.0.40
codegen_flags: <defaults>
</compile_context>

<pallas_src>
import functools

import numpy as np

import jax
import jax.numpy as jnp
from jax import lax
from jax.experimental import pallas as pl
from jax.experimental.pallas import tpu as pltpu

EPS = 1e-5


def _intra_block_kernel(x_ref, w_ref, o_ref, sum_ref, ssq_ref, *,
                        n_pt, tile_p, n_anchor, c_out, inv_n, eps):
    """Fused (gather-folded) IntraSO3Conv + InstanceNorm2d(affine=False) + ReLU.

    grid = (B, n_pt), dims = ("parallel", "arbitrary")
    x_ref   : [1, A*C_in, tile_p]   lane-dense-in-P input tile (bf16 or f32)
    w_ref   : [A*C_out, A*C_in]     gather-folded conv weight
    o_ref   : [1, A*C_out, p_pad]   batch-resident output slab (staging + final)
    sum_ref, ssq_ref : VMEM [C_out, 1] f32 per-channel moment accumulators.
    """
    pt = pl.program_id(1)

    @pl.when(pt == 0)
    def _init():
        sum_ref[...] = jnp.zeros_like(sum_ref)
        ssq_ref[...] = jnp.zeros_like(ssq_ref)

    # One MXU matmul per tile: [A*C_out, A*C_in] @ [A*C_in, tile_p] -> f32.
    y = jnp.dot(w_ref[...], x_ref[0], preferred_element_type=jnp.float32)

    # Stage the un-normalized tile in the VMEM-resident output slab.
    off = pl.multiple_of(pt * tile_p, tile_p)
    o_ref[0, :, pl.ds(off, tile_p)] = y.astype(o_ref.dtype)

    # Per-channel moments: reduce the anchor axis on the VPU first (cheap elementwise
    # adds), then a single cross-lane (XLU) reduction per statistic.
    y3 = y.reshape(n_anchor, c_out, tile_p)
    s = jnp.sum(jnp.sum(y3, axis=0), axis=1, keepdims=True)            # [C_out, 1]
    ss = jnp.sum(jnp.sum(y3 * y3, axis=0), axis=1, keepdims=True)      # [C_out, 1]
    sum_ref[...] += s
    ssq_ref[...] += ss

    @pl.when(pt == n_pt - 1)
    def _finalize():
        mean = sum_ref[...] * inv_n                                    # [C_out, 1]
        var = jnp.maximum(ssq_ref[...] * inv_n - mean * mean, 0.0)
        rstd = lax.rsqrt(var + eps)
        mean3 = mean[None]                                             # [1, C_out, 1]
        rstd3 = rstd[None]
        for t in range(n_pt):                      # static, aligned vector ld/st
            lo, hi = t * tile_p, (t + 1) * tile_p
            yt = o_ref[0, :, lo:hi].reshape(n_anchor, c_out, tile_p)
            yn = jnp.maximum((yt - mean3) * rstd3, 0.0)
            o_ref[0, :, lo:hi] = yn.reshape(n_anchor * c_out, tile_p).astype(
                o_ref.dtype)


@functools.partial(
    jax.jit, static_argnames=("idx", "tile_p", "p_pad", "use_bf16", "out_dtype"))
def _impl(feats, W, *, idx, tile_p, p_pad, use_bf16, out_dtype):
    idx_np = np.asarray(idx, dtype=np.int32)
    A, K = idx_np.shape
    B, C_in, P, _ = feats.shape
    C_out = W.shape[0]
    n_pt = p_pad // tile_p
    compute_dtype = jnp.bfloat16 if use_bf16 else jnp.float32
    in_itemsize = 2 if use_bf16 else 4
    out_itemsize = jnp.dtype(out_dtype).itemsize

    # --- fold the static intra-anchor gather into a block-structured weight -------
    # Wbig[a*C_out + o, a'*C_in + c] = sum_k 1[idx[a,k] == a'] * W[o, c*K + k]
    gather = np.zeros((A, K * C_in, A * C_in), np.float32)
    eye = np.eye(C_in, dtype=np.float32)
    for a in range(A):
        for k in range(K):
            src = int(idx_np[a, k])
            gather[a, k * C_in:(k + 1) * C_in, src * C_in:(src + 1) * C_in] += eye
    w_kc = W.reshape(C_out, C_in, K).transpose(0, 2, 1).reshape(C_out, K * C_in)
    w_big = jnp.einsum("om,amn->aon", w_kc, jnp.asarray(gather),
                       precision=lax.Precision.HIGHEST)
    w_big = w_big.reshape(A * C_out, A * C_in).astype(compute_dtype)

    # --- anchor-major, lane-dense-in-P input slab: [B, A*C_in, p_pad] --------------
    x = jnp.transpose(feats, (0, 3, 1, 2)).reshape(B, A * C_in, P)
    x = x.astype(compute_dtype)
    if p_pad != P:
        x = jnp.pad(x, ((0, 0), (0, 0), (0, p_pad - P)))   # zeros: no stat leak

    kernel = functools.partial(
        _intra_block_kernel, n_pt=n_pt, tile_p=tile_p, n_anchor=A, c_out=C_out,
        inv_n=1.0 / float(P * A), eps=EPS)

    # VMEM hint from actual block sizes (double-buffered) + matmul temp + slack.
    x_blk = A * C_in * tile_p * in_itemsize
    w_bytes = A * C_out * A * C_in * in_itemsize
    o_blk = A * C_out * p_pad * out_itemsize
    y_tmp = A * C_out * tile_p * 4
    need = 2 * (x_blk + w_bytes + o_blk) + 2 * y_tmp + (4 << 20)
    vmem_limit = int(min(max(need, 16 << 20), 60 << 20))

    out3 = pl.pallas_call(
        kernel,
        out_shape=jax.ShapeDtypeStruct((B, A * C_out, p_pad), out_dtype),
        grid_spec=pltpu.PrefetchScalarGridSpec(
            num_scalar_prefetch=0,
            grid=(B, n_pt),
            in_specs=[
                pl.BlockSpec((1, A * C_in, tile_p), lambda b, pt: (b, 0, pt)),
                pl.BlockSpec((A * C_out, A * C_in), lambda b, pt: (0, 0)),
            ],
            out_specs=pl.BlockSpec((1, A * C_out, p_pad), lambda b, pt: (b, 0, 0)),
            scratch_shapes=[pltpu.VMEM((C_out, 1), jnp.float32),
                            pltpu.VMEM((C_out, 1), jnp.float32)],
        ),
        compiler_params=pltpu.CompilerParams(
            dimension_semantics=("parallel", "arbitrary"),
            vmem_limit_bytes=vmem_limit,
        ),
    )(x, w_big)

    return out3   # lane-dense [B, A*C_out, p_pad]


def intra_so3_conv_block(feats, W, intra_idx, *, max_tile_p=1024, use_bf16=True,
                         out_dtype=jnp.float32, anchor_major_out=False):
    """feats [B, C_in, P, A] f32, W [C_out, C_in*K] (c-major, k-minor),
    intra_idx [A, K] integer table (static anchor geometry).

    Returns feats_out [B, C_out, P, A] (PyTorch layout) by default, or the
    zero-copy lane-dense [B, A, C_out, P] slab when anchor_major_out=True
    (preferred when the downstream block is also a Pallas kernel: it skips a
    full read+write HBM pass for the transpose).  xyz / anchors of the
    SphericalPointCloud pass through the block unchanged."""
    idx = np.asarray(intra_idx, dtype=np.int32)
    A, K = idx.shape
    B, C_in, P, A_f = feats.shape
    C_out = W.shape[0]
    assert A_f == A and W.shape[1] == C_in * K
    assert max_tile_p % 128 == 0

    # Pad P only to 128-multiples; split into n_pt near-equal 128-aligned tiles.
    p128 = ((P + 127) // 128) * 128
    n_pt = max(1, -(-p128 // max_tile_p))
    tile_p = -(-(p128 // 128) // n_pt) * 128
    p_pad = n_pt * tile_p

    # Single-pass staging slab must fit comfortably in VMEM (v7x has 64 MiB).
    assert A * C_out * p_pad * jnp.dtype(out_dtype).itemsize <= (24 << 20), \
        "P too large for single-pass staging"   # TODO(synk): 2-phase fallback

    out3 = _impl(feats, W, idx=tuple(map(tuple, idx.tolist())),
                 tile_p=int(tile_p), p_pad=int(p_pad), use_bf16=use_bf16,
                 out_dtype=out_dtype)
    out = out3[:, :, :P].reshape(B, A, C_out, P)
    if anchor_major_out:
        return out                                    # [B, A, C_out, P]
    return jnp.transpose(out, (0, 2, 3, 1))           # [B, C_out, P, A]


def _reference(feats, W, intra_idx):
    """Pure-JAX reference mirroring the PyTorch module (f32, eval mode)."""
    B, C_in, P, A = feats.shape
    K = intra_idx.shape[1]
    C_out = W.shape[0]
    grouped = jnp.take(feats, jnp.asarray(intra_idx).reshape(-1), axis=3)
    grouped = grouped.reshape(B, C_in, P, A, K)
    grouped = jnp.transpose(grouped, (0, 1, 4, 2, 3))          # [B, C_in, K, P, A]
    x = grouped.reshape(B, C_in * K, P * A)
    y = jnp.einsum("oc,bcn->bon", W, x,
                   precision=jax.lax.Precision.HIGHEST).reshape(B, C_out, P, A)
    mean = jnp.mean(y, axis=(2, 3), keepdims=True)
    var = jnp.mean((y - mean) ** 2, axis=(2, 3), keepdims=True)
    y = (y - mean) / jnp.sqrt(var + EPS)
    return jnp.maximum(y, 0.0)


if __name__ == "__main__":
    key = jax.random.PRNGKey(0)
    B, C_in, C_out, A, K = 2, 8, 32, 12, 4
    k_feat1, k_feat2, k_w, k_idx = jax.random.split(key, 4)

    # "xavier_normal(gain=0.001)"-style weight init for BasicSO3Conv
    fan = C_out + C_in * K
    W = 0.001 * jnp.sqrt(2.0 / fan) * jax.random.normal(
        k_w, (C_out, C_in * K), dtype=jnp.float32)

    # fixed (general, non-ring) intra-anchor neighbour table
    intra_idx = jax.random.randint(k_idx, (A, K), 0, A, dtype=jnp.int32)
    intra_idx_np = np.asarray(jax.device_get(intra_idx))

    # --- test 1: small P, default config (bf16 matmul inputs) ---
    P1 = 16
    feats1 = jax.random.normal(k_feat1, (B, C_in, P1, A), dtype=jnp.float32)
    xyz1 = jax.random.normal(key, (B, 3, P1), dtype=jnp.float32)
    anchors = jnp.tile(jnp.eye(3, dtype=jnp.float32)[None], (A, 1, 1))
    out1 = jax.block_until_ready(intra_so3_conv_block(feats1, W, intra_idx_np))
    ref1 = _reference(feats1, W, intra_idx)
    assert out1.shape == (B, C_out, P1, A)
    assert jnp.allclose(out1, ref1, atol=7e-2, rtol=5e-2), "bf16 path mismatch"

    # lane-dense (no post-kernel transpose) output path
    out1_am = jax.block_until_ready(
        intra_so3_conv_block(feats1, W, intra_idx_np, anchor_major_out=True))
    assert out1_am.shape == (B, A, C_out, P1)
    assert jnp.allclose(jnp.transpose(out1_am, (0, 2, 3, 1)), ref1,
                        atol=7e-2, rtol=5e-2), "anchor-major path mismatch"

    # --- test 2: multi-tile P with zero-padding, f32 path, tight tolerance ---
    P2 = 300
    feats2 = jax.random.normal(k_feat2, (B, C_in, P2, A), dtype=jnp.float32)
    out2 = jax.block_until_ready(
        intra_so3_conv_block(feats2, W, intra_idx_np, max_tile_p=128,
                             use_bf16=False))
    ref2 = _reference(feats2, W, intra_idx)
    assert out2.shape == (B, C_out, P2, A)
    assert jnp.allclose(out2, ref2, atol=1e-4, rtol=1e-4), "f32 path mismatch"

    # the block returns SphericalPointCloud(xyz, feat, anchors); xyz/anchors pass through
    _ = (xyz1, out1, anchors)
    print("KERNEL_OK")
</pallas_src>

<mosaic_0001>
module attributes {stable_mosaic.version = 11 : i64} {
  func.func @_intra_block_kernel(%arg0: i32, %arg1: i32, %arg2: memref<1x96x128xbf16, #tpu.memory_space<vmem>>, %arg3: memref<384x96xbf16, #tpu.memory_space<vmem>>, %arg4: memref<1x384x128xf32, #tpu.memory_space<vmem>>, %arg5: memref<32x1xf32, #tpu.memory_space<vmem>>, %arg6: memref<32x1xf32, #tpu.memory_space<vmem>>) attributes {dimension_semantics = [#tpu.dimension_semantics<parallel>, #tpu.dimension_semantics<arbitrary>], iteration_bounds = array<i64: 2, 1>, scalar_prefetch = 0 : i64, scratch_operands = 2 : i64, tpu.core_type = #tpu.core_type<tc>, window_params = [{transform_indices = @transform_0, window_bounds = array<i64: 1, 96, 128>}, {pipeline_mode = #tpu.pipeline_mode<synchronous>, transform_indices = @transform_1, window_bounds = array<i64: 384, 96>}, {transform_indices = @transform_2, window_bounds = array<i64: 1, 384, 128>}]} {
    %c0_i32 = arith.constant 0 : i32
    %0 = arith.cmpi eq, %arg1, %c0_i32 : i32
    %1 = arith.extui %0 : i1 to i32
    %c0_i32_0 = arith.constant 0 : i32
    %2 = arith.cmpi ne, %1, %c0_i32_0 : i32
    scf.if %2 {
      %cst_21 = arith.constant 0.000000e+00 : f32
      %30 = vector.broadcast %cst_21 : f32 to vector<32x1xf32>
      %c0_22 = arith.constant 0 : index
      %c0_23 = arith.constant 0 : index
      %31 = vector.load %arg5[%c0_22, %c0_23] : memref<32x1xf32, #tpu.memory_space<vmem>>, vector<32x1xf32>
      tpu.vector_store %arg5[%c0_22, %c0_23], %30 {strides = array<i32>} : memref<32x1xf32, #tpu.memory_space<vmem>>, vector<32x1xf32>,
      %cst_24 = arith.constant 0.000000e+00 : f32
      %32 = vector.broadcast %cst_24 : f32 to vector<32x1xf32>
      %c0_25 = arith.constant 0 : index
      %c0_26 = arith.constant 0 : index
      %33 = vector.load %arg6[%c0_25, %c0_26] : memref<32x1xf32, #tpu.memory_space<vmem>>, vector<32x1xf32>
      tpu.vector_store %arg6[%c0_25, %c0_26], %32 {strides = array<i32>} : memref<32x1xf32, #tpu.memory_space<vmem>>, vector<32x1xf32>,
    } else {
    }
    %c0 = arith.constant 0 : index
    %c0_1 = arith.constant 0 : index
    %3 = vector.load %arg3[%c0, %c0_1] : memref<384x96xbf16, #tpu.memory_space<vmem>>, vector<384x96xbf16>
    %c0_2 = arith.constant 0 : index
    %c0_3 = arith.constant 0 : index
    %c0_4 = arith.constant 0 : index
    %4 = vector.load %arg2[%c0_2, %c0_3, %c0_4] : memref<1x96x128xbf16, #tpu.memory_space<vmem>>, vector<1x96x128xbf16>
    %5 = vector.shape_cast %4 : vector<1x96x128xbf16> to vector<96x128xbf16>
    %cst = arith.constant dense<0.000000e+00> : vector<384x128xf32>
    %6 = tpu.matmul %3, %5, %cst {dimension_numbers = #tpu.dot_dimension_numbers<[1], [0], [0], [1], [0, 0, 1, 1], [], []>} : vector<384x96xbf16>, vector<96x128xbf16>, vector<384x128xf32> -> vector<384x128xf32>
    %c128_i32 = arith.constant 128 : i32
    %7 = arith.muli %arg1, %c128_i32 : i32
    %8 = tpu.assume_multiple %7, 128 : i32
    %c0_5 = arith.constant 0 : index
    %c0_6 = arith.constant 0 : index
    %9 = arith.index_cast %8 : i32 to index
    %10 = vector.load %arg4[%c0_5, %c0_6, %9] : memref<1x384x128xf32, #tpu.memory_space<vmem>>, vector<1x384x128xf32>
    %11 = vector.shape_cast %10 : vector<1x384x128xf32> to vector<384x128xf32>
    %12 = vector.shape_cast %6 : vector<384x128xf32> to vector<1x384x128xf32>
    tpu.vector_store %arg4[%c0_5, %c0_6, %9], %12 {strides = array<i32>} : memref<1x384x128xf32, #tpu.memory_space<vmem>>, vector<1x384x128xf32>,
    %13 = vector.shape_cast %6 : vector<384x128xf32> to vector<12x32x128xf32>
    %cst_7 = arith.constant dense<0.000000e+00> : vector<32x128xf32>
    %14 = vector.multi_reduction <add>, %13, %cst_7 [0] : vector<12x32x128xf32> to vector<32x128xf32>
    %cst_8 = arith.constant dense<0.000000e+00> : vector<32xf32>
    %15 = vector.multi_reduction <add>, %14, %cst_8 [1] : vector<32x128xf32> to vector<32xf32>
    %16 = vector.shape_cast %15 : vector<32xf32> to vector<32x1xf32>
    %17 = arith.mulf %13, %13 : vector<12x32x128xf32>
    %cst_9 = arith.constant dense<0.000000e+00> : vector<32x128xf32>
    %18 = vector.multi_reduction <add>, %17, %cst_9 [0] : vector<12x32x128xf32> to vector<32x128xf32>
    %cst_10 = arith.constant dense<0.000000e+00> : vector<32xf32>
    %19 = vector.multi_reduction <add>, %18, %cst_10 [1] : vector<32x128xf32> to vector<32xf32>
    %20 = vector.shape_cast %19 : vector<32xf32> to vector<32x1xf32>
    %c0_11 = arith.constant 0 : index
    %c0_12 = arith.constant 0 : index
    %21 = vector.load %arg5[%c0_11, %c0_12] : memref<32x1xf32, #tpu.memory_space<vmem>>, vector<32x1xf32>
    %22 = arith.addf %21, %16 : vector<32x1xf32>
    %c0_13 = arith.constant 0 : index
    %c0_14 = arith.constant 0 : index
    %23 = vector.load %arg5[%c0_13, %c0_14] : memref<32x1xf32, #tpu.memory_space<vmem>>, vector<32x1xf32>
    tpu.vector_store %arg5[%c0_13, %c0_14], %22 {strides = array<i32>} : memref<32x1xf32, #tpu.memory_space<vmem>>, vector<32x1xf32>,
    %c0_15 = arith.constant 0 : index
    %c0_16 = arith.constant 0 : index
    %24 = vector.load %arg6[%c0_15, %c0_16] : memref<32x1xf32, #tpu.memory_space<vmem>>, vector<32x1xf32>
    %25 = arith.addf %24, %20 : vector<32x1xf32>
    %c0_17 = arith.constant 0 : index
    %c0_18 = arith.constant 0 : index
    %26 = vector.load %arg6[%c0_17, %c0_18] : memref<32x1xf32, #tpu.memory_space<vmem>>, vector<32x1xf32>
    tpu.vector_store %arg6[%c0_17, %c0_18], %25 {strides = array<i32>} : memref<32x1xf32, #tpu.memory_space<vmem>>, vector<32x1xf32>,
    %c0_i32_19 = arith.constant 0 : i32
    %27 = arith.cmpi eq, %arg1, %c0_i32_19 : i32
    %28 = arith.extui %27 : i1 to i32
    %c0_i32_20 = arith.constant 0 : i32
    %29 = arith.cmpi ne, %28, %c0_i32_20 : i32
    scf.if %29 {
      %c0_21 = arith.constant 0 : index
      %c0_22 = arith.constant 0 : index
      %30 = vector.load %arg5[%c0_21, %c0_22] : memref<32x1xf32, #tpu.memory_space<vmem>>, vector<32x1xf32>
      %cst_23 = arith.constant 0.00520833349 : f32
      %31 = vector.broadcast %cst_23 : f32 to vector<32x1xf32>
      %32 = arith.mulf %30, %31 : vector<32x1xf32>
      %c0_24 = arith.constant 0 : index
      %c0_25 = arith.constant 0 : index
      %33 = vector.load %arg6[%c0_24, %c0_25] : memref<32x1xf32, #tpu.memory_space<vmem>>, vector<32x1xf32>
      %cst_26 = arith.constant 0.00520833349 : f32
      %34 = vector.broadcast %cst_26 : f32 to vector<32x1xf32>
      %35 = arith.mulf %33, %34 : vector<32x1xf32>
      %36 = arith.mulf %32, %32 : vector<32x1xf32>
      %37 = arith.subf %35, %36 : vector<32x1xf32>
      %cst_27 = arith.constant 0.000000e+00 : f32
      %38 = vector.broadcast %cst_27 : f32 to vector<32x1xf32>
      %39 = arith.maximumf %37, %38 : vector<32x1xf32>
      %cst_28 = arith.constant 9.99999974E-6 : f32
      %40 = vector.broadcast %cst_28 : f32 to vector<32x1xf32>
      %41 = arith.addf %39, %40 : vector<32x1xf32>
      %42 = math.rsqrt %41 : vector<32x1xf32>
      %43 = vector.shape_cast %32 : vector<32x1xf32> to vector<1x32x1xf32>
      %44 = vector.shape_cast %42 : vector<32x1xf32> to vector<1x32x1xf32>
      %c0_29 = arith.constant 0 : index
      %c0_30 = arith.constant 0 : index
      %c0_31 = arith.constant 0 : index
      %45 = vector.load %arg4[%c0_29, %c0_30, %c0_31] : memref<1x384x128xf32, #tpu.memory_space<vmem>>, vector<1x384x128xf32>
      %46 = vector.shape_cast %45 : vector<1x384x128xf32> to vector<384x128xf32>
      %47 = vector.shape_cast %46 : vector<384x128xf32> to vector<12x32x128xf32>
      %48 = vector.broadcast %43 : vector<1x32x1xf32> to vector<12x32x128xf32>
      %49 = arith.subf %47, %48 : vector<12x32x128xf32>
      %50 = vector.broadcast %44 : vector<1x32x1xf32> to vector<12x32x128xf32>
      %51 = arith.mulf %49, %50 : vector<12x32x128xf32>
      %cst_32 = arith.constant 0.000000e+00 : f32
      %52 = vector.broadcast %cst_32 : f32 to vector<12x32x128xf32>
      %53 = arith.maximumf %51, %52 : vector<12x32x128xf32>
      %54 = vector.shape_cast %53 : vector<12x32x128xf32> to vector<384x128xf32>
      %c0_33 = arith.constant 0 : index
      %c0_34 = arith.constant 0 : index
      %c0_35 = arith.constant 0 : index
      %55 = vector.load %arg4[%c0_33, %c0_34, %c0_35] : memref<1x384x128xf32, #tpu.memory_space<vmem>>, vector<1x384x128xf32>
      %56 = vector.shape_cast %55 : vector<1x384x128xf32> to vector<384x128xf32>
      %57 = vector.shape_cast %54 : vector<384x128xf32> to vector<1x384x128xf32>
      tpu.vector_store %arg4[%c0_33, %c0_34, %c0_35], %57 {strides = array<i32>} : memref<1x384x128xf32, #tpu.memory_space<vmem>>, vector<1x384x128xf32>,
    } else {
    }
    return
  }
  func.func @transform_0(%arg0: i32, %arg1: i32) -> (i32, i32, i32) {
    %c0_i32 = arith.constant 0 : i32
    %c0_i32_0 = arith.constant 0 : i32
    return %arg0, %c0_i32, %arg1 : i32, i32, i32
  }
  func.func @transform_1(%arg0: i32, %arg1: i32) -> (i32, i32) {
    %c0_i32 = arith.constant 0 : i32
    %c0_i32_0 = arith.constant 0 : i32
    %c0_i32_1 = arith.constant 0 : i32
    return %c0_i32, %c0_i32_0 : i32, i32
  }
  func.func @transform_2(%arg0: i32, %arg1: i32) -> (i32, i32, i32) {
    %c0_i32 = arith.constant 0 : i32
    %c0_i32_0 = arith.constant 0 : i32
    %c0_i32_1 = arith.constant 0 : i32
    return %arg0, %c0_i32, %c0_i32_0 : i32, i32, i32
  }
}

</mosaic_0001>

<bundles_post_ra>
// kernel: _impl.1
= control target key start
LH: loop header
LB: loop body
LE: loop exit
PB: predicated region body
PF: predicated region fallthrough
CT: control target
= control target key end

     0   :  { %7 = vsyncpa [#allocation5], 0  ;;  %s2451_s0 = inlined_call_operand.vmem [shape: bf16[2,96,128], index: 0, kind: input, shape index: {}]   ;;  %s2452_s1 = inlined_call_operand.vmem [shape: bf16[384,96], index: 1, kind: input, shape index: {}]   ;;  %s2453_s2 = inlined_call_operand.hbm [shape: f32[2,384,128], index: 2, kind: output, shape index: {}]  }
   0x1   :  { %9 = vsyncpa [#allocation5 + $0x1], 0  ;;  %s1699_s9 = smov 0   ;;  %s1701_s10 = smov 0  }
   0x2   :  { %s1703_s11 = smov 0   ;;  %s1705_s12 = smov 0  }
   0x3   :  { %s1707_s13 = smov 0   ;;  %s1709_s14 = smov 0  }
   0x4 LB: > { %s1332_s15 = sadd.s32 4294967295, %s1677_s14   ;;  %s1333_s16 = sadd.s32 4294967294, %s1677_s14   ;;  %s1677_s14 = sphi %s1709_s14, %s15_s14   ;;  %s1673_s13 = sphi %s1707_s13, %s2607_s13   ;;  %s1669_s12 = sphi %s1705_s12, %s2606_s12   ;;  %s1665_s11 = sphi %s1703_s11, %s2605_s11   ;;  %s1661_s10 = sphi %s1701_s10, %s2604_s10   ;;  %s1657_s9 = sphi %s1699_s9, %s2603_s9  }
   0x5   : > { %s27_s17 = sadd.s32 1, %s1673_s13  ;;  %s83_s18 = sadd.s32 1, %s1665_s11 }
   0x6   : > { %p29_p0 = scmp.ge.s32.totalorder %s27_s17, 2  ;;  %p93_p1 = scmp.ne.s32.totalorder %s1665_s11, %s1661_s10 }
   0x7   : > { %p94_p2 = scmp.eq.s32.totalorder %s1332_s15, 1  ;;  %p99_p3 = scmp.ne.s32.totalorder %s1661_s10, %s1657_s9 }
   0x8   : > { %s2609_s17 = smov (%p29_p0, %s27_s17), 0  ;;  %p100_p5 = scmp.eq.s32.totalorder %s1333_s16, 1 }
   0x9   : > { %p1739_p4 = por %p94_p2, %p93_p1  ;;  %s80_s20 = ssub.s32 %s1673_s13, %s2609_s17 }
   0xa   : > { %p1336_p6 = scmp.ge.s32.totalorder %s1677_s14, 1  ;;  %p81_p7 = scmp.eq.s32.totalorder %s80_s20, 0 }
   0xb   : > { %p1746_p8 = por %p100_p5, %p99_p3  ;;  %p132_p9 = scmp.lt.s32.totalorder %s1677_s14, 3 }
   0xc   : > { %s1752_s22 = scalar_select %p81_p7, %s1665_s11, %s83_s18  }
   0xd   : > { %p133_p10 = pnand %p1336_p6, %p132_p9 }
   0xf   : > { %136 = sbr.rel (%p133_p10) target bundleno = 686 (0x2ae), region = 28 }
  0x16   : > { %p157_p11 = scmp.lt.s32.totalorder %s1669_s12, 1  ;;  %v1567_v0 = vld [vmem:[%s2452_s1] sm:$0xff]   ;;  %vm395_vm0 = vcmask 785408   ;;  %v1568_v8 = vld [vmem:[%s2452_s1 + $0x8] sm:$0xff]   ;;  %v1569_v10 = vld [vmem:[%s2452_s1 + $0x10] sm:$0xff]   ;;  %vm170_vm1 = vcmask 7168  }
  0x17   : > { %1437 = vmatprep.mubr.msk.bf16.mxu0 %vm395_vm0, %v1567_v0  ;;  %v1571_v1 = vld [vmem:[%s2452_s1 + $0x60] sm:$0xff]   ;;  %v1572_v9 = vld [vmem:[%s2452_s1 + $0x68] sm:$0xff]   ;;  %v1575_v11 = vld [vmem:[%s2452_s1 + $0x70] sm:$0xff]   ;;  %v1679_v30 = vmov 0.0   ;;  %s154_s20 = sand.u32 1, %s1661_s10  }
  0x18   : > { %s158_s25 = scalar_select %p157_p11, %s1669_s12, 1  ;;  %1461 = vmatprep.mubr.msk.bf16.mxu1 %vm395_vm0, %v1571_v1  ;;  %v1570_v12 = vld [vmem:[%s2452_s1 + $0x18] sm:$0xff]   ;;  %v1573_v14 = vld [vmem:[%s2452_s1 + $0x20] sm:$0xff]   ;;  %v1574_v16 = vld [vmem:[%s2452_s1 + $0x28] sm:$0xff]   ;;  %173 = vst.msk [vmem:[#allocation2 + $0x10] sm:$0xff] %vm170_vm1, %v1679_v30 }
  0x19   : > { %v1576_v13 = vld [vmem:[%s2452_s1 + $0x78] sm:$0xff]   ;;  %v1579_v15 = vld [vmem:[%s2452_s1 + $0x80] sm:$0xff]   ;;  %v1580_v17 = vld [vmem:[%s2452_s1 + $0x88] sm:$0xff]   ;;  %171 = vst.msk [vmem:[#allocation2] sm:$0xff] %vm170_vm1, %v1679_v30  ;;  %s2217_s23 = smul.u32 384, %s154_s20  ;;  %s2405_s29 = scalar_lea.sflag [#allocation5], %s154_s20 }
  0x1a   : > { %s1498_s26 = smul.u32 48, %s158_s25  ;;  %v1577_v18 = vld [vmem:[%s2452_s1 + $0x30] sm:$0xff]   ;;  %v1578_v20 = vld [vmem:[%s2452_s1 + $0x38] sm:$0xff]   ;;  %v1581_v22 = vld [vmem:[%s2452_s1 + $0x40] sm:$0xff]   ;;  %172 = vst.msk [vmem:[#allocation2 + $0x8] sm:$0xff] %vm170_vm1, %v1679_v30 }
  0x1b   : > { %v1583_v19 = vld [vmem:[%s2452_s1 + $0x90] sm:$0xff]   ;;  %v1584_v21 = vld [vmem:[%s2452_s1 + $0x98] sm:$0xff]   ;;  %v1587_v23 = vld [vmem:[%s2452_s1 + $0xa0] sm:$0xff]   ;;  %174 = vst.msk [vmem:[#allocation2 + $0x18] sm:$0xff] %vm170_vm1, %v1679_v30  ;;  %s2236_s24 = scalar_lea.vmem [#allocation4], %s2217_s23  ;;  %s1499_s25 = smul.u32 6144, %s1669_s12 }
  0x1c   : > { %s164_s3 = scalar_lea.vmem %s2451_s0, %s1498_s26  ;;  %v1582_v24 = vld [vmem:[%s2452_s1 + $0x48] sm:$0xff]   ;;  %v1585_v26 = vld [vmem:[%s2452_s1 + $0x50] sm:$0xff]   ;;  %v1586_v28 = vld [vmem:[%s2452_s1 + $0x58] sm:$0xff]   ;;  %175 = vst.msk [vmem:[#allocation3] sm:$0xff] %vm170_vm1, %v1679_v30  ;;  %s1255_s12 = sshll.u32 %s2236_s24, 4  ;;  %s2389_s12 = int_to_ptr.vmem [resolvable:$true] %s1255_s12 }
  0x1d   : > { %v1561_v2 = vld [vmem:[%s164_s3] sm:$0xff]   ;;  %v1562_v3 = vld [vmem:[%s164_s3 + $0x8] sm:$0xff]   ;;  %v1563_v4 = vld [vmem:[%s164_s3 + $0x10] sm:$0xff]   ;;  %176 = vst.msk [vmem:[#allocation3 + $0x8] sm:$0xff] %vm170_vm1, %v1679_v30  ;;  %s2387_s28 = scalar_lea.hbm %s2453_s2, %s1499_s25  ;;  %s1599_s30 = scalar_lea.vmem %s2389_s12, 6144 }
  0x1e   : > { %1425 = vmatprep.subr.bf16.mxu0 %v1561_v2  ;;  %1485 = vmatprep.subr.bf16.mxu1 %v1561_v2  ;;  %v1564_v5 = vld [vmem:[%s164_s3 + $0x18] sm:$0xff]   ;;  %v1565_v6 = vld [vmem:[%s164_s3 + $0x20] sm:$0xff]   ;;  %v1566_v7 = vld [vmem:[%s164_s3 + $0x28] sm:$0xff]   ;;  %177 = vst.msk [vmem:[#allocation3 + $0x10] sm:$0xff] %vm170_vm1, %v1679_v30  ;;  %p1600_p12 = scmp.ne.s32.totalorder %s2389_s12, %s1599_s30  ;;  %s1681_s3 = smov [#allocation4]  }
  0x1f   : > { %1426 = vmatpush3.bf16.msra.mxu0 %v1561_v2  ;;  %1491 = vmatpush3.bf16.msra.mxu1 %v1561_v2  ;;  %v1588_v25 = vld [vmem:[%s2452_s1 + $0xa8] sm:$0xff]   ;;  %v1589_v27 = vld [vmem:[%s2452_s1 + $0xb0] sm:$0xff]   ;;  %v1590_v29 = vld [vmem:[%s2452_s1 + $0xb8] sm:$0xff]   ;;  %178 = vst.msk [vmem:[#allocation3 + $0x18] sm:$0xff] %vm170_vm1, %v1679_v30  ;;  %s1603_s4 = sshll.u32 %s1681_s3, 4  ;;  %s1604_s4 = int_to_ptr.vmem [resolvable:$false] %s1603_s4 }
  0x20   : > { %1427 = vmatprep.subr.bf16.mxu0 %v1562_v3  ;;  %1486 = vmatprep.subr.bf16.mxu1 %v1562_v3  ;;  %p1601_p13 = pnand %p1600_p12, %p1739_p4  ;;  %s1605_s5 = scalar_lea.vmem %s1604_s4, 12288 }
  0x21   : > { %p1606_p1 = scmp.lt.s32.totalorder %s2389_s12, %s1604_s4  ;;  %p1607_p2 = scmp.lt.s32.totalorder %s1605_s5, %s1599_s30 }
  0x22   : > { %p1602_p0 = pneg %p1601_p13 }
  0x23   : > { %1428 = vmatpush3.bf16.msra.mxu0 %v1562_v3  ;;  %1492 = vmatpush3.bf16.msra.mxu1 %v1562_v3  ;;  %p1608_p3 = por %p1607_p2, %p1606_p1 }
  0x24   : > { %1429 = vmatprep.subr.bf16.mxu0 %v1563_v4  ;;  %1487 = vmatprep.subr.bf16.mxu1 %v1563_v4 }
  0x25   : > { %p1609_p5 = pnand %p1608_p3, %p1602_p0 }
  0x27   : > { %1430 = vmatpush3.bf16.msra.mxu0 %v1563_v4  ;;  %1493 = vmatpush3.bf16.msra.mxu1 %v1563_v4 }
  0x28   : > { %1431 = vmatprep.subr.bf16.mxu0 %v1564_v5  ;;  %1488 = vmatprep.subr.bf16.mxu1 %v1564_v5 }
  0x2b   : > { %1432 = vmatpush3.bf16.msra.mxu0 %v1564_v5  ;;  %1494 = vmatpush3.bf16.msra.mxu1 %v1564_v5 }
  0x2c   : > { %1433 = vmatprep.subr.bf16.mxu0 %v1565_v6  ;;  %1489 = vmatprep.subr.bf16.mxu1 %v1565_v6 }
  0x2f   : > { %1434 = vmatpush3.bf16.msra.mxu0 %v1565_v6  ;;  %1495 = vmatpush3.bf16.msra.mxu1 %v1565_v6 }
  0x30   : > { %1435 = vmatprep.subr.bf16.mxu0 %v1566_v7  ;;  %1490 = vmatprep.subr.bf16.mxu1 %v1566_v7 }
  0x33   : > { %1436 = vmatpush3.bf16.msra.mxu0 %v1566_v7  ;;  %1496 = vmatpush3.bf16.msra.mxu1 %v1566_v7 }
  0x36   : > { %1438 = vmatmul.mubr.msk.bf16.vlgmr.msra.gmra.mrb[0].mxu0 %vm395_vm0, %v1568_v8  ;;  %1462 = vmatmul.mubr.msk.bf16.vlgmr.msra.gmra.mrb[0].mxu1 %vm395_vm0, %v1572_v9 }
  0x37   : > { %1441 = vmatprep.mubr.msk.bf16.mxu0 %vm395_vm0, %v1569_v10  ;;  %1465 = vmatprep.mubr.msk.bf16.mxu1 %vm395_vm0, %v1575_v11 }
  0x3e   : > { %1442 = vmatmul.mubr.msk.bf16.gmra.mrb[4].mxu0 %vm395_vm0, %v1570_v12  ;;  %1466 = vmatmul.mubr.msk.bf16.gmra.mrb[4].mxu1 %vm395_vm0, %v1576_v13 }
  0x3f   : > { %1445 = vmatprep.mubr.msk.bf16.mxu0 %vm395_vm0, %v1573_v14  ;;  %1469 = vmatprep.mubr.msk.bf16.mxu1 %vm395_vm0, %v1579_v15 }
  0x46   : > { %1446 = vmatmul.mubr.msk.bf16.gmra.mrb[8].mxu0 %vm395_vm0, %v1574_v16  ;;  %1470 = vmatmul.mubr.msk.bf16.gmra.mrb[8].mxu1 %vm395_vm0, %v1580_v17 }
  0x47   : > { %1449 = vmatprep.mubr.msk.bf16.mxu0 %vm395_vm0, %v1577_v18  ;;  %1473 = vmatprep.mubr.msk.bf16.mxu1 %vm395_vm0, %v1583_v19 }
  0x4e   : > { %1450 = vmatmul.mubr.msk.bf16.gmra.mrb[12].mxu0 %vm395_vm0, %v1578_v20  ;;  %1474 = vmatmul.mubr.msk.bf16.gmra.mrb[12].mxu1 %vm395_vm0, %v1584_v21 }
  0x4f   : > { %1453 = vmatprep.mubr.msk.bf16.mxu0 %vm395_vm0, %v1581_v22  ;;  %1477 = vmatprep.mubr.msk.bf16.mxu1 %vm395_vm0, %v1587_v23 }
  0x56   : > { %1454 = vmatmul.mubr.msk.bf16.gmra.mrb[16].mxu0 %vm395_vm0, %v1582_v24  ;;  %1478 = vmatmul.mubr.msk.bf16.gmra.mrb[16].mxu1 %vm395_vm0, %v1588_v25 }
  0x57   : > { %1457 = vmatprep.mubr.msk.bf16.mxu0 %vm395_vm0, %v1585_v26  ;;  %1481 = vmatprep.mubr.msk.bf16.mxu1 %vm395_vm0, %v1589_v27 }
  0x5e   : > { %1458 = vmatmul.mubr.msk.bf16.gmra.mrb[20].mxu0 %vm395_vm0, %v1586_v28  ;;  %1482 = vmatmul.mubr.msk.bf16.gmra.mrb[20].mxu1 %vm395_vm0, %v1590_v29 }
 0x109   : > { %v1863_v31 = vpop.f32.mrb[0].mxu0  ;;  %v1865_v32 = vpop.f32.mrb[0].mxu1 }
 0x10a   : > { %2503 = vst [vmem:[#allocation7_spill] sm:$0xff] %v1863_v31  ;;  %2504 = vst [vmem:[#allocation8_spill] sm:$0xff] %v1865_v32  ;;  %v1867_v33 = vpop.f32.mrb[1].mxu0  ;;  %v1869_v34 = vpop.f32.mrb[1].mxu1  ;;  %v799_v41 = vmul.f32 %v1863_v31, %v1863_v31 }
 0x10b   : > { %2505 = vst [vmem:[#allocation9_spill] sm:$0xff] %v1867_v33  ;;  %v1871_v35 = vpop.f32.mrb[2].mxu0  ;;  %v1873_v36 = vpop.f32.mrb[2].mxu1  ;;  %v797_v46 = vmul.f32 %v1867_v33, %v1867_v33 }
 0x10c   : > { %2506 = vst [vmem:[#allocation10_spill] sm:$0xff] %v1871_v35  ;;  %2507 = vst [vmem:[#allocation11_spill] sm:$0xff] %v1873_v36  ;;  %v1875_v37 = vpop.f32.mrb[3].mxu0  ;;  %v1877_v38 = vpop.f32.mrb[3].mxu1  ;;  %v800_v51 = vmul.f32 %v1871_v35, %v1871_v35 }
 0x10d   : > { %2508 = vst [vmem:[#allocation12_spill] sm:$0xff] %v1875_v37  ;;  %v798_v57 = vmul.f32 %v1875_v37, %v1875_v37 }
 0x111   : > { %v1879_v39 = vpop.f32.mrb[4].mxu0  ;;  %v1881_v40 = vpop.f32.mrb[4].mxu1 }
 0x112   : > { %2509 = vst [vmem:[#allocation13_spill] sm:$0xff] %v1879_v39  ;;  %v767_v42 = vadd.f32 %v1879_v39, %v1863_v31  ;;  %v803_v43 = vmul.f32 %v1879_v39, %v1879_v39  ;;  %v1889_v44 = vpop.f32.mrb[5].mxu0  ;;  %v1891_v45 = vpop.f32.mrb[5].mxu1 }
 0x113   : > { %2510 = vst [vmem:[#allocation14_spill] sm:$0xff] %v1889_v44  ;;  %v745_v47 = vadd.f32 %v1889_v44, %v1867_v33  ;;  %v801_v48 = vmul.f32 %v1889_v44, %v1889_v44  ;;  %v1899_v49 = vpop.f32.mrb[6].mxu0  ;;  %v1901_v50 = vpop.f32.mrb[6].mxu1 }
 0x114   : > { %2511 = vst [vmem:[#allocation15_spill] sm:$0xff] %v1899_v49  ;;  %2512 = vst [vmem:[#allocation16_spill] sm:$0xff] %v1901_v50  ;;  %v867_v52 = vadd.f32 %v803_v43, %v799_v41  ;;  %v778_v53 = vadd.f32 %v1899_v49, %v1871_v35  ;;  %v804_v54 = vmul.f32 %v1899_v49, %v1899_v49  ;;  %v1909_v55 = vpop.f32.mrb[7].mxu0  ;;  %v1911_v56 = vpop.f32.mrb[7].mxu1 }
 0x115   : > { %2513 = vst [vmem:[#allocation17_spill] sm:$0xff] %v1909_v55  ;;  %v845_v58 = vadd.f32 %v801_v48, %v797_v46  ;;  %v756_v59 = vadd.f32 %v1909_v55, %v1875_v37  ;;  %v802_v60 = vmul.f32 %v1909_v55, %v1909_v55 }
 0x116   : > { %v878_v61 = vadd.f32 %v804_v54, %v800_v51 }
 0x117   : > { %v856_v62 = vadd.f32 %v802_v60, %v798_v57 }
 0x119   : > { %v1919_v63 = vpop.f32.mrb[8].mxu0  ;;  %v1921_v0 = vpop.f32.mrb[8].mxu1 }
 0x11a   : > { %2514 = vst [vmem:[#allocation18_spill] sm:$0xff] %v1919_v63  ;;  %v768_v1 = vadd.f32 %v1919_v63, %v767_v42  ;;  %v807_v2 = vmul.f32 %v1919_v63, %v1919_v63  ;;  %v1926_v3 = vpop.f32.mrb[9].mxu0  ;;  %v1928_v4 = vpop.f32.mrb[9].mxu1 }
 0x11b   : > { %2515 = vst [vmem:[#allocation19_spill] sm:$0xff] %v1926_v3  ;;  %v746_v5 = vadd.f32 %v745_v47, %v1926_v3  ;;  %v805_v6 = vmul.f32 %v1926_v3, %v1926_v3  ;;  %v1933_v7 = vpop.f32.mrb[10].mxu0  ;;  %v1935_v8 = vpop.f32.mrb[10].mxu1 }
 0x11c   : > { %2516 = vst [vmem:[#allocation20_spill] sm:$0xff] %v1933_v7  ;;  %2517 = vst [vmem:[#allocation21_spill] sm:$0xff] %v1935_v8  ;;  %v868_v9 = vadd.f32 %v867_v52, %v807_v2  ;;  %v779_v10 = vadd.f32 %v1933_v7, %v778_v53  ;;  %v808_v11 = vmul.f32 %v1933_v7, %v1933_v7  ;;  %v1940_v12 = vpop.f32.mrb[11].mxu0  ;;  %v1942_v13 = vpop.f32.mrb[11].mxu1 }
 0x11d   : > { %2518 = vst [vmem:[#allocation22_spill] sm:$0xff] %v1940_v12  ;;  %v846_v14 = vadd.f32 %v845_v58, %v805_v6  ;;  %v757_v15 = vadd.f32 %v756_v59, %v1940_v12  ;;  %v806_v16 = vmul.f32 %v1940_v12, %v1940_v12 }
 0x11e   : > { %v879_v17 = vadd.f32 %v878_v61, %v808_v11 }
 0x11f   : > { %v857_v18 = vadd.f32 %v856_v62, %v806_v16 }
 0x121   : > { %v1947_v19 = vpop.f32.mrb[12].mxu0  ;;  %v1949_v20 = vpop.f32.mrb[12].mxu1 }
 0x122   : > { %2519 = vst [vmem:[#allocation23_spill] sm:$0xff] %v1947_v19  ;;  %v769_v21 = vadd.f32 %v1947_v19, %v768_v1  ;;  %v811_v22 = vmul.f32 %v1947_v19, %v1947_v19  ;;  %v1954_v23 = vpop.f32.mrb[13].mxu0  ;;  %v1956_v24 = vpop.f32.mrb[13].mxu1 }
 0x123   : > { %2520 = vst [vmem:[#allocation24_spill] sm:$0xff] %v1954_v23  ;;  %v747_v25 = vadd.f32 %v746_v5, %v1954_v23  ;;  %v809_v26 = vmul.f32 %v1954_v23, %v1954_v23  ;;  %v1961_v27 = vpop.f32.mrb[14].mxu0  ;;  %v1963_v28 = vpop.f32.mrb[14].mxu1  ;;  %v823_v5 = vmul.f32 %v1865_v32, %v1865_v32 }
 0x124   : > { %2521 = vst [vmem:[#allocation25_spill] sm:$0xff] %v1961_v27  ;;  %2522 = vst [vmem:[#allocation26_spill] sm:$0xff] %v1963_v28  ;;  %v869_v29 = vadd.f32 %v868_v9, %v811_v22  ;;  %v780_v30 = vadd.f32 %v1961_v27, %v779_v10  ;;  %v812_v41 = vmul.f32 %v1961_v27, %v1961_v27  ;;  %v1968_v42 = vpop.f32.mrb[15].mxu0  ;;  %v1970_v43 = vpop.f32.mrb[15].mxu1 }
 0x125   : > { %2523 = vst [vmem:[#allocation27_spill] sm:$0xff] %v1968_v42  ;;  %v847_v46 = vadd.f32 %v846_v14, %v809_v26  ;;  %v758_v47 = vadd.f32 %v757_v15, %v1968_v42  ;;  %v810_v48 = vmul.f32 %v1968_v42, %v1968_v42  ;;  %v821_v15 = vmul.f32 %v1869_v34, %v1869_v34 }
 0x126   : > { %v880_v51 = vadd.f32 %v879_v17, %v812_v41  ;;  %v822_v22 = vmul.f32 %v1877_v38, %v1877_v38  ;;  %v826_v41 = vmul.f32 %v1911_v56, %v1911_v56 }
 0x127   : > { %v858_v52 = vadd.f32 %v857_v18, %v810_v48  ;;  %v829_v48 = vmul.f32 %v1928_v4, %v1928_v4 }
 0x129   : > { %v1975_v53 = vpop.f32.mrb[16].mxu0  ;;  %v1977_v54 = vpop.f32.mrb[16].mxu1 }
 0x12a   : > { %2524 = vst [vmem:[#allocation28_spill] sm:$0xff] %v1975_v53  ;;  %v770_v57 = vadd.f32 %v1975_v53, %v769_v21  ;;  %v815_v58 = vmul.f32 %v1975_v53, %v1975_v53  ;;  %v1982_v59 = vpop.f32.mrb[17].mxu0  ;;  %v1984_v60 = vpop.f32.mrb[17].mxu1  ;;  %v824_v21 = vmul.f32 %v1873_v36, %v1873_v36 }
 0x12b   : > { %2525 = vst [vmem:[#allocation29_spill] sm:$0xff] %v1982_v59  ;;  %v748_v61 = vadd.f32 %v747_v25, %v1982_v59  ;;  %v813_v62 = vmul.f32 %v1982_v59, %v1982_v59  ;;  %v1989_v1 = vpop.f32.mrb[18].mxu0  ;;  %v1991_v2 = vpop.f32.mrb[18].mxu1  ;;  %v2013_v25 = vmul.f32 %v1881_v40, %v1881_v40  ;;  %v837_v27 = vmul.f32 %v1984_v60, %v1984_v60 }
 0x12c   : > { %2526 = vst [vmem:[#allocation30_spill] sm:$0xff] %v1989_v1  ;;  %2527 = vst [vmem:[#allocation31_spill] sm:$0xff] %v1991_v2  ;;  %v870_v6 = vadd.f32 %v869_v29, %v815_v58  ;;  %v781_v9 = vadd.f32 %v1989_v1, %v780_v30  ;;  %v816_v10 = vmul.f32 %v1989_v1, %v1989_v1  ;;  %v1998_v11 = vpop.f32.mrb[19].mxu0  ;;  %v2000_v14 = vpop.f32.mrb[19].mxu1 }
 0x12d   : > { %2528 = vst [vmem:[#allocation32_spill] sm:$0xff] %v1998_v11  ;;  %v848_v16 = vadd.f32 %v847_v46, %v813_v62  ;;  %v759_v17 = vadd.f32 %v758_v47, %v1998_v11  ;;  %v814_v18 = vmul.f32 %v1998_v11, %v1998_v11  ;;  %v825_v29 = vmul.f32 %v1891_v45, %v1891_v45 }
 0x12e   : > { %v881_v26 = vadd.f32 %v880_v51, %v816_v10  ;;  %v828_v30 = vmul.f32 %v1901_v50, %v1901_v50  ;;  %v2023_v47 = vmul.f32 %v1921_v0, %v1921_v0  ;;  %v832_v51 = vmul.f32 %v1935_v8, %v1935_v8 }
 0x12f   : > { %v859_v46 = vadd.f32 %v858_v52, %v814_v18  ;;  %v830_v58 = vmul.f32 %v1942_v13, %v1942_v13  ;;  %v2033_v62 = vmul.f32 %v1949_v20, %v1949_v20  ;;  %v833_v52 = vmul.f32 %v1956_v24, %v1956_v24 }
 0x130   : > { %v836_v10 = vmul.f32 %v1963_v28, %v1963_v28  ;;  %v2041_v18 = vmul.f32 %v1970_v43, %v1970_v43  ;;  %v2054_v1 = vmul.f32 %v1977_v54, %v1977_v54  ;;  %v840_v59 = vmul.f32 %v1991_v2, %v1991_v2 }
 0x131   : > { %v2043_v11 = vpop.f32.mrb[20].mxu0  ;;  %v2045_v42 = vpop.f32.mrb[20].mxu1  ;;  %v838_v23 = vmul.f32 %v2000_v14, %v2000_v14 }
 0x132   : > { %2529 = vst [vmem:[#allocation33_spill] sm:$0xff] %v2043_v11  ;;  %v771_v12 = vadd.f32 %v2043_v11, %v770_v57  ;;  %v819_v55 = vmul.f32 %v2043_v11, %v2043_v11  ;;  %v2050_v37 = vpop.f32.mrb[21].mxu0  ;;  %2531 = vst [vmem:[#allocation35_spill] sm:$0xff] %v2054_v1  ;;  %v2058_v7 = vpop.f32.mrb[21].mxu1 }
 0x133   : > { %2530 = vst [vmem:[#allocation34_spill] sm:$0xff] %v2050_v37  ;;  %v749_v49 = vadd.f32 %v748_v61, %v2050_v37  ;;  %v817_v35 = vmul.f32 %v2050_v37, %v2050_v37  ;;  %v2063_v57 = vpop.f32.mrb[22].mxu0  ;;  %v2069_v3 = vpop.f32.mrb[22].mxu1 }
 0x134   : > { %2532 = vst [vmem:[#allocation36_spill] sm:$0xff] %v2063_v57  ;;  %v772_v44 = vadd.f32 %v1865_v32, %v771_v12  ;;  %v871_v33 = vadd.f32 %v870_v6, %v819_v55  ;;  %v782_v11 = vadd.f32 %v2063_v57, %v781_v9  ;;  %v820_v61 = vmul.f32 %v2063_v57, %v2063_v57  ;;  %v2075_v53 = vpop.f32.mrb[23].mxu0  ;;  %v2077_v37 = vpop.f32.mrb[23].mxu1 }
 0x135   : > { %2533 = vst [vmem:[#allocation37_spill] sm:$0xff] %v2077_v37  ;;  %v750_v19 = vadd.f32 %v749_v49, %v1869_v34  ;;  %v849_v63 = vadd.f32 %v848_v16, %v817_v35  ;;  %v760_v39 = vadd.f32 %v759_v17, %v2075_v53  ;;  %v818_v31 = vmul.f32 %v2075_v53, %v2075_v53 }
 0x136   : > { %v773_v12 = vadd.f32 %v1881_v40, %v772_v44  ;;  %v872_v55 = vadd.f32 %v871_v33, %v823_v5  ;;  %v783_v6 = vadd.f32 %v1873_v36, %v782_v11  ;;  %v882_v9 = vadd.f32 %v881_v26, %v820_v61 }
 0x137   : > { %v751_v57 = vadd.f32 %v750_v19, %v1891_v45  ;;  %v850_v32 = vadd.f32 %v849_v63, %v821_v15  ;;  %v761_v1 = vadd.f32 %v760_v39, %v1877_v38  ;;  %v860_v37 = vadd.f32 %v859_v46, %v818_v31 }
 0x138   : > { %v784_v49 = vadd.f32 %v1901_v50, %v783_v6  ;;  %v883_v35 = vadd.f32 %v882_v9, %v824_v21  ;;  %v774_v16 = vadd.f32 %v1921_v0, %v773_v12  ;;  %v843_v17 = vmul.f32 %v2045_v42, %v2045_v42 }
 0x139   : > { %v762_v44 = vadd.f32 %v761_v1, %v1911_v56  ;;  %v861_v33 = vadd.f32 %v860_v37, %v822_v22  ;;  %v752_v5 = vadd.f32 %v751_v57, %v1928_v4  ;;  %v851_v11 = vadd.f32 %v850_v32, %v825_v29 }
 0x13a   : > { %v775_v19 = vadd.f32 %v1949_v20, %v774_v16  ;;  %v785_v63 = vadd.f32 %v1935_v8, %v784_v49  ;;  %v841_v31 = vmul.f32 %v2058_v7, %v2058_v7  ;;  %v884_v39 = vadd.f32 %v883_v35, %v828_v30 }
 0x13b   : > { %v862_v15 = vadd.f32 %v861_v33, %v826_v41  ;;  %v753_v21 = vadd.f32 %v752_v5, %v1956_v24  ;;  %v763_v26 = vadd.f32 %v762_v44, %v1942_v13  ;;  %v852_v46 = vadd.f32 %v851_v11, %v829_v48 }
 0x13c   : > { %v776_v1 = vadd.f32 %v1977_v54, %v775_v19  ;;  %v786_v37 = vadd.f32 %v1963_v28, %v785_v63  ;;  %v885_v22 = vadd.f32 %v884_v39, %v832_v51  ;;  %v873_v32 = vadd.f32 %v872_v55, %v2013_v25  ;;  %v2534_v16 = vld [vmem:[#allocation37_spill] sm:$0xff]  ;;  %v897_v63 = vld [vmem:[#allocation2] sm:$0xff] }
 0x13d   : > { %v754_v29 = vadd.f32 %v753_v21, %v1984_v60  ;;  %v764_v57 = vadd.f32 %v763_v26, %v1970_v43  ;;  %v863_v61 = vadd.f32 %v862_v15, %v830_v58  ;;  %v853_v12 = vadd.f32 %v852_v46, %v833_v52  ;;  %v900_v21 = vld [vmem:[#allocation2 + $0x18] sm:$0xff]  ;;  %v898_v26 = vld [vmem:[#allocation2 + $0x8] sm:$0xff] }
 0x13e   : > { %v777_v30 = vadd.f32 %v2045_v42, %v776_v1  ;;  %v787_v41 = vadd.f32 %v1991_v2, %v786_v37  ;;  %v886_v6 = vadd.f32 %v885_v22, %v836_v10  ;;  %v874_v48 = vadd.f32 %v873_v32, %v2023_v47  ;;  %v911_v22 = vld [vmem:[#allocation3 + $0x8] sm:$0xff]  ;;  %v910_v32 = vld [vmem:[#allocation3] sm:$0xff] }
 0x13f   : > { %v755_v9 = vadd.f32 %v754_v29, %v2058_v7  ;;  %v765_v49 = vadd.f32 %v764_v57, %v2000_v14  ;;  %v864_v51 = vadd.f32 %v863_v61, %v2041_v18  ;;  %v854_v25 = vadd.f32 %v853_v12, %v837_v27  ;;  %v2535_v18 = vld [vmem:[#allocation35_spill] sm:$0xff] }
 0x140   : > { %793 = vadd.xlane.f32.xlu1 %v777_v30  ;;  %v788_v55 = vadd.f32 %v2069_v3, %v787_v41  ;;  %v844_v58 = vmul.f32 %v2069_v3, %v2069_v3  ;;  %v887_v52 = vadd.f32 %v886_v6, %v840_v59  ;;  %v875_v35 = vadd.f32 %v874_v48, %v2033_v62  ;;  %v899_v62 = vld [vmem:[#allocation2 + $0x10] sm:$0xff]  ;;  %v913_v30 = vld [vmem:[#allocation3 + $0x18] sm:$0xff] }
 0x141   : > { %v842_v10 = vmul.f32 %v2534_v16, %v2534_v16  ;;  %789 = vadd.xlane.f32.xlu0 %v755_v9  ;;  %v766_v47 = vadd.f32 %v765_v49, %v2534_v16  ;;  %v865_v44 = vadd.f32 %v864_v51, %v838_v23  ;;  %v855_v33 = vadd.f32 %v854_v25, %v841_v31  ;;  %v912_v48 = vld [vmem:[#allocation3 + $0x10] sm:$0xff] }
 0x142   : > { %v888_v5 = vadd.f32 %v887_v52, %v844_v58  ;;  %v876_v27 = vadd.f32 %v875_v35, %v2535_v18  ;;  %v1680_v59 = vmov 0  }
 0x143   : > { %v866_v11 = vadd.f32 %v865_v44, %v842_v10  ;;  %1560 = vset.pattern.permute.xlu1 %v1680_v59  ;;  %1559 = vset.pattern.permute.xlu0 %v1680_v59 }
 0x144   : > { %795 = vadd.xlane.f32.xlu1 %v788_v55  ;;  %v877_v19 = vadd.f32 %v876_v27, %v843_v17 }
 0x145   : > { %791 = vadd.xlane.f32.xlu0 %v766_v47 }
 0x148   : > { %891 = vadd.xlane.f32.xlu1 %v866_v11 }
 0x149   : > { %889 = vadd.xlane.f32.xlu0 %v855_v33 }
 0x14c   : > { %895 = vadd.xlane.f32.xlu1 %v888_v5 }
 0x14d   : > { %893 = vadd.xlane.f32.xlu0 %v877_v19 }
 0x1cd   : > { %v794_v39 = vpop.xlane.xlu1 %793 }
 0x1ce   : > { %v903_v15 = vadd.f32 %v899_v62, %v794_v39  ;;  %v790_v23 = vpop.xlane.xlu0 %789 }
 0x1cf   : > { %v901_v31 = vadd.f32 %v897_v63, %v790_v23 }
 0x1d0   : > { %908 = vst.msk [vmem:[#allocation2 + $0x10] sm:$0xff] %vm170_vm1, %v903_v15 }
 0x1d1   : > { %906 = vst.msk [vmem:[#allocation2] sm:$0xff] %vm170_vm1, %v901_v31  ;;  %v796_v17 = vpop.xlane.xlu1 %795 }
 0x1d2   : > { %v904_v46 = vadd.f32 %v900_v21, %v796_v17  ;;  %v792_v1 = vpop.xlane.xlu0 %791 }
 0x1d3   : > { %v902_v37 = vadd.f32 %v898_v26, %v792_v1 }
 0x1d4   : > { %909 = vst.msk [vmem:[#allocation2 + $0x18] sm:$0xff] %vm170_vm1, %v904_v46 }
 0x1d5   : > { %907 = vst.msk [vmem:[#allocation2 + $0x8] sm:$0xff] %vm170_vm1, %v902_v37  ;;  %v892_v29 = vpop.xlane.xlu1 %891 }
 0x1d6   : > { %v915_v57 = vadd.f32 %v911_v22, %v892_v29  ;;  %v890_v61 = vpop.xlane.xlu0 %889 }
 0x1d7   : > { %v914_v12 = vadd.f32 %v910_v32, %v890_v61  ;;  %v927_v41 = vld [vmem:[#allocation2 + $0x10] sm:$0xff] }
 0x1d8   : > { %919 = vst.msk [vmem:[#allocation3 + $0x8] sm:$0xff] %vm170_vm1, %v915_v57  ;;  %v931_v6 = vmul.f32 0.0052083335, %v927_v41  ;;  %v925_v9 = vld [vmem:[#allocation2] sm:$0xff] }
 0x1d9   : > { %918 = vst.msk [vmem:[#allocation3] sm:$0xff] %vm170_vm1, %v914_v12  ;;  %v896_v49 = vpop.xlane.xlu1 %895  ;;  %v929_v51 = vmul.f32 0.0052083335, %v925_v9  ;;  %v2536_v9 = vld [vmem:[#allocation7_spill] sm:$0xff] }
 0x1da   : > { %v917_v25 = vadd.f32 %v913_v30, %v896_v49  ;;  %1021 = vperm.xlu1 %1560, %v931_v6   ;;  %v894_v55 = vpop.xlane.xlu0 %893  ;;  %v943_v27 = vmul.f32 %v931_v6, %v931_v6 }
 0x1db   : > { %v916_v58 = vadd.f32 %v912_v48, %v894_v55  ;;  %1011 = vperm.xlu0 %1559, %v929_v51   ;;  %v928_v52 = vld [vmem:[#allocation2 + $0x18] sm:$0xff]  ;;  %v941_v18 = vmul.f32 %v929_v51, %v929_v51  ;;  %v2537_v51 = vld [vmem:[#allocation13_spill] sm:$0xff] }
 0x1dc   : > { %921 = vst.msk [vmem:[#allocation3 + $0x18] sm:$0xff] %vm170_vm1, %v917_v25  ;;  %v932_v35 = vmul.f32 0.0052083335, %v928_v52  ;;  %v926_v10 = vld [vmem:[#allocation2 + $0x8] sm:$0xff]  ;;  %v2538_v55 = vld [vmem:[#allocation18_spill] sm:$0xff]  ;;  %v2539_v52 = vld [vmem:[#allocation23_spill] sm:$0xff] }
 0x1dd   : > { %920 = vst.msk [vmem:[#allocation3 + $0x10] sm:$0xff] %vm170_vm1, %v916_v58  ;;  %v930_v44 = vmul.f32 0.0052083335, %v926_v10 }
 0x1de   : > { %1026 = vperm.xlu1 %1560, %v932_v35   ;;  %v944_v17 = vmul.f32 %v932_v35, %v932_v35 }
 0x1df   : > { %v934_v5 = vld [vmem:[#allocation3 + $0x8] sm:$0xff]  ;;  %v942_v62 = vmul.f32 %v930_v44, %v930_v44 }
 0x1e0   : > { %v933_v47 = vld [vmem:[#allocation3] sm:$0xff]  ;;  %v938_v59 = vmul.f32 0.0052083335, %v934_v5 }
 0x1e1   : > { %v937_v33 = vmul.f32 0.0052083335, %v933_v47  ;;  %v2540_v47 = vld [vmem:[#allocation28_spill] sm:$0xff] }
 0x1e2   : > { %1016 = vperm.xlu1 %1560, %v930_v44   ;;  %v946_v21 = vsub.f32 %v938_v59, %v942_v62 }
 0x1e3   : > { %v945_v19 = vsub.f32 %v937_v33, %v941_v18  ;;  %v936_v39 = vld [vmem:[#allocation3 + $0x18] sm:$0xff]  ;;  %v2541_v33 = vld [vmem:[#allocation33_spill] sm:$0xff]  ;;  %v2542_v18 = vld [vmem:[#allocation8_spill] sm:$0xff] }
 0x1e4   : > { %v935_v11 = vld [vmem:[#allocation3 + $0x10] sm:$0xff]  ;;  %v940_v31 = vmul.f32 0.0052083335, %v936_v39  ;;  %v950_v22 = vmax.f32 %v946_v21, 0.0 }
 0x1e5   : > { %v939_v63 = vmul.f32 0.0052083335, %v935_v11  ;;  %v949_v23 = vmax.f32 %v945_v19, 0.0  ;;  %v2543_v39 = vld [vmem:[#allocation9_spill] sm:$0xff] }
 0x1e6   : > { %v948_v37 = vsub.f32 %v940_v31, %v944_v17  ;;  %v954_v29 = vadd.f32 1e-05, %v950_v22 }
 0x1e7   : > { %v947_v15 = vsub.f32 %v939_v63, %v943_v27  ;;  %v953_v1 = vadd.f32 1e-05, %v949_v23  ;;  %v2544_v23 = vld [vmem:[#allocation14_spill] sm:$0xff] }
 0x1e8   : > { %v952_v32 = vmax.f32 %v948_v37, 0.0 }
 0x1e9   : > { %v951_v26 = vmax.f32 %v947_v15, 0.0 }
 0x1ea   : > { %v956_v57 = vadd.f32 1e-05, %v952_v32 }
 0x1eb   : > { %v955_v46 = vadd.f32 1e-05, %v951_v26 }
 0x1ed   : > { %1591 = vrsqrt.f32 %v955_v46 }
 0x1ee   : > { %1593 = vrsqrt.f32 %v953_v1 }
 0x1ef   : > { %1595 = vrsqrt.f32 %v954_v29  ;;  %v2555_v29 = vld [vmem:[#allocation12_spill] sm:$0xff] }
 0x1f0   : > { %1597 = vrsqrt.f32 %v956_v57 }
 0x1f7   : > { %v1592_v61 = vpop.eup %1591 }
 0x1f8   : > { %1089 = vperm.xlu1 %1560, %v1592_v61   ;;  %v1594_v12 = vpop.eup %1593  ;;  %v2549_v61 = vld [vmem:[#allocation10_spill] sm:$0xff] }
 0x1f9   : > { %v1596_v30 = vpop.eup %1595 }
 0x1fa   : > { %v1598_v41 = vpop.eup %1597 }
 0x1fc   : > { %1079 = vperm.xlu1 %1560, %v1594_v12  }
 0x200   : > { %1084 = vperm.xlu1 %1560, %v1596_v30   ;;  %v2550_v30 = vld [vmem:[#allocation15_spill] sm:$0xff] }
 0x204   : > { %1094 = vperm.xlu1 %1560, %v1598_v41  }
 0x259   : > { %v2126_v6 = vpop.permute.xlu1 %1021 }
 0x25a   : > { %v1031_v49 = vsub.f32 %v2536_v9, %v2126_v6  ;;  %v1035_v25 = vsub.f32 %v2537_v51, %v2126_v6  ;;  %v1039_v58 = vsub.f32 %v2538_v55, %v2126_v6  ;;  %v1043_v35 = vsub.f32 %v2539_v52, %v2126_v6  ;;  %v2138_v10 = vpop.permute.xlu0 %1011  ;;  %v2552_v51 = vld [vmem:[#allocation25_spill] sm:$0xff]  ;;  %v2557_v55 = vld [vmem:[#allocation22_spill] sm:$0xff] }
 0x25b   : > { %v1047_v44 = vsub.f32 %v2540_v47, %v2126_v6  ;;  %v1051_v5 = vsub.f32 %v2541_v33, %v2126_v6  ;;  %v1055_v27 = vsub.f32 %v2542_v18, %v2126_v6  ;;  %v1059_v11 = vsub.f32 %v1881_v40, %v2126_v6  ;;  %v2545_v40 = vld [vmem:[#allocation19_spill] sm:$0xff]  ;;  %v2556_v9 = vld [vmem:[#allocation17_spill] sm:$0xff]  ;;  %v2559_v18 = vld [vmem:[#allocation32_spill] sm:$0xff] }
 0x25c   : > { %v1063_v19 = vsub.f32 %v1921_v0, %v2126_v6  ;;  %v1067_v59 = vsub.f32 %v1949_v20, %v2126_v6  ;;  %v1071_v62 = vsub.f32 %v1977_v54, %v2126_v6  ;;  %v1075_v63 = vsub.f32 %v2045_v42, %v2126_v6  ;;  %v2546_v0 = vld [vmem:[#allocation24_spill] sm:$0xff]  ;;  %v2547_v20 = vld [vmem:[#allocation29_spill] sm:$0xff]  ;;  %v2548_v54 = vld [vmem:[#allocation34_spill] sm:$0xff] }
 0x25d   : > { %v2128_v48 = vpop.permute.xlu1 %1026  ;;  %v2551_v6 = vld [vmem:[#allocation20_spill] sm:$0xff]  ;;  %v2558_v47 = vld [vmem:[#allocation27_spill] sm:$0xff] }
 0x261   : > { %v2180_v57 = vpop.permute.xlu1 %1016 }
 0x277   : > { %v1090_v22 = vpop.permute.xlu1 %1089 }
 0x278   : > { %v1099_v1 = vmul.f32 %v1090_v22, %v1031_v49  ;;  %v1103_v17 = vmul.f32 %v1090_v22, %v1035_v25  ;;  %v1107_v26 = vmul.f32 %v1090_v22, %v1039_v58  ;;  %v1111_v42 = vmul.f32 %v1090_v22, %v1043_v35 }
 0x279   : > { %v1115_v21 = vmul.f32 %v1090_v22, %v1047_v44  ;;  %v1119_v31 = vmul.f32 %v1090_v22, %v1051_v5  ;;  %v1123_v12 = vmul.f32 %v1090_v22, %v1055_v27  ;;  %v1127_v15 = vmul.f32 %v1090_v22, %v1059_v11 }
 0x27a   : > { %v1131_v50 = vmul.f32 %v1090_v22, %v1063_v19  ;;  %v1135_v36 = vmul.f32 %v1090_v22, %v1067_v59  ;;  %v1139_v41 = vmul.f32 %v1090_v22, %v1071_v62  ;;  %v1143_v8 = vmul.f32 %v1090_v22, %v1075_v63 }
 0x27b   : > { %v1147_v32 = vmax.f32 %v1099_v1, 0.0  ;;  %v1151_v28 = vmax.f32 %v1103_v17, 0.0  ;;  %v1155_v33 = vmax.f32 %v1107_v26, 0.0  ;;  %v1159_v46 = vmax.f32 %v1111_v42, 0.0  ;;  %v1080_v2 = vpop.permute.xlu1 %1079 }
 0x27c   : > { %v1163_v52 = vmax.f32 %v1115_v21, 0.0  ;;  %v1167_v37 = vmax.f32 %v1119_v31, 0.0  ;;  %v1171_v49 = vmax.f32 %v1123_v12, 0.0  ;;  %v1175_v25 = vmax.f32 %v1127_v15, 0.0 }
 0x27d   : > { %v1179_v58 = vmax.f32 %v1131_v50, 0.0  ;;  %v1183_v35 = vmax.f32 %v1135_v36, 0.0  ;;  %v1187_v44 = vmax.f32 %v1139_v41, 0.0  ;;  %v1191_v5 = vmax.f32 %v1143_v8, 0.0  ;;  %1195 = vst [vmem:[%s2236_s24 + $0x10] sm:$0xff] %v1147_v32  ;;  %1199 = vst [vmem:[%s2236_s24 + $0x30] sm:$0xff] %v1151_v28 }
 0x27e   : > { %1203 = vst [vmem:[%s2236_s24 + $0x50] sm:$0xff] %v1155_v33  ;;  %1207 = vst [vmem:[%s2236_s24 + $0x70] sm:$0xff] %v1159_v46  ;;  %v2560_v36 = vsub.f32 %v2543_v39, %v2138_v10  ;;  %v2561_v8 = vsub.f32 %v2544_v23, %v2138_v10  ;;  %v2562_v11 = vsub.f32 %v2545_v40, %v2138_v10 }
 0x27f   : > { %1211 = vst [vmem:[%s2236_s24 + $0x90] sm:$0xff] %v1163_v52  ;;  %1215 = vst [vmem:[%s2236_s24 + $0xb0] sm:$0xff] %v1167_v37  ;;  %v2563_v28 = vsub.f32 %v2546_v0, %v2138_v10  ;;  %v2564_v62 = vsub.f32 %v2547_v20, %v2138_v10  ;;  %v2565_v39 = vsub.f32 %v2548_v54, %v2138_v10 }
 0x280   : > { %1219 = vst [vmem:[%s2236_s24 + $0xd0] sm:$0xff] %v1171_v49  ;;  %1223 = vst [vmem:[%s2236_s24 + $0xf0] sm:$0xff] %v1175_v25  ;;  %v1097_v50 = vmul.f32 %v1080_v2, %v2560_v36  ;;  %v1101_v27 = vmul.f32 %v1080_v2, %v2561_v8  ;;  %v1105_v19 = vmul.f32 %v1080_v2, %v2562_v11 }
 0x281   : > { %v1109_v59 = vmul.f32 %v1080_v2, %v2563_v28  ;;  %1227 = vst [vmem:[%s2236_s24 + $0x110] sm:$0xff] %v1179_v58  ;;  %1231 = vst [vmem:[%s2236_s24 + $0x130] sm:$0xff] %v1183_v35  ;;  %v1113_v63 = vmul.f32 %v1080_v2, %v2564_v62  ;;  %v1117_v15 = vmul.f32 %v1080_v2, %v2565_v39 }
 0x282   : > { %1235 = vst [vmem:[%s2236_s24 + $0x150] sm:$0xff] %v1187_v44  ;;  %1239 = vst [vmem:[%s2236_s24 + $0x170] sm:$0xff] %v1191_v5  ;;  %v2566_v23 = vsub.f32 %v1869_v34, %v2138_v10  ;;  %v2567_v40 = vsub.f32 %v1891_v45, %v2138_v10  ;;  %v2568_v0 = vsub.f32 %v1928_v4, %v2138_v10  ;;  %v1145_v45 = vmax.f32 %v1097_v50, 0.0 }
 0x283   : > { %v2569_v20 = vsub.f32 %v1956_v24, %v2138_v10  ;;  %v2570_v54 = vsub.f32 %v1984_v60, %v2138_v10  ;;  %v2571_v34 = vsub.f32 %v2058_v7, %v2138_v10  ;;  %v1149_v1 = vmax.f32 %v1101_v27, 0.0  ;;  %v1085_v24 = vpop.permute.xlu1 %1084 }
 0x284   : > { %v1121_v31 = vmul.f32 %v1080_v2, %v2566_v23  ;;  %v1125_v21 = vmul.f32 %v1080_v2, %v2567_v40  ;;  %v1129_v26 = vmul.f32 %v1080_v2, %v2568_v0  ;;  %v1153_v4 = vmax.f32 %v1105_v19, 0.0  ;;  %1193 = vst [vmem:[%s2236_s24] sm:$0xff] %v1145_v45  ;;  %v2588_v45 = vld [vmem:[#allocation30_spill] sm:$0xff] }
 0x285   : > { %v1133_v17 = vmul.f32 %v1080_v2, %v2569_v20  ;;  %v1137_v46 = vmul.f32 %v1080_v2, %v2570_v54  ;;  %v1141_v42 = vmul.f32 %v1080_v2, %v2571_v34  ;;  %v1157_v37 = vmax.f32 %v1109_v59, 0.0  ;;  %1197 = vst [vmem:[%s2236_s24 + $0x20] sm:$0xff] %v1149_v1 }
 0x286   : > { %v1161_v22 = vmax.f32 %v1113_v63, 0.0  ;;  %v1165_v60 = vmax.f32 %v1117_v15, 0.0  ;;  %v1169_v32 = vmax.f32 %v1121_v31, 0.0  ;;  %v1173_v12 = vmax.f32 %v1125_v21, 0.0  ;;  %1201 = vst [vmem:[%s2236_s24 + $0x40] sm:$0xff] %v1153_v4  ;;  %v2590_v4 = vld [vmem:[#allocation36_spill] sm:$0xff] }
 0x287   : > { %v1177_v41 = vmax.f32 %v1129_v26, 0.0  ;;  %v1181_v7 = vmax.f32 %v1133_v17, 0.0  ;;  %v1185_v2 = vmax.f32 %v1137_v46, 0.0  ;;  %v1189_v10 = vmax.f32 %v1141_v42, 0.0  ;;  %1205 = vst [vmem:[%s2236_s24 + $0x60] sm:$0xff] %v1157_v37 }
 0x288   : > { %1209 = vst [vmem:[%s2236_s24 + $0x80] sm:$0xff] %v1161_v22  ;;  %1213 = vst [vmem:[%s2236_s24 + $0xa0] sm:$0xff] %v1165_v60  ;;  %v2572_v52 = vsub.f32 %v2555_v29, %v2180_v57  ;;  %v2573_v49 = vsub.f32 %v2556_v9, %v2180_v57  ;;  %v2574_v58 = vsub.f32 %v2557_v55, %v2180_v57  ;;  %v2594_v60 = vld [vmem:[#allocation16_spill] sm:$0xff] }
 0x289   : > { %1217 = vst [vmem:[%s2236_s24 + $0xc0] sm:$0xff] %v1169_v32  ;;  %1221 = vst [vmem:[%s2236_s24 + $0xe0] sm:$0xff] %v1173_v12  ;;  %v2575_v44 = vsub.f32 %v2558_v47, %v2180_v57  ;;  %v2576_v29 = vsub.f32 %v2559_v18, %v2180_v57  ;;  %v2577_v9 = vsub.f32 %v2075_v53, %v2180_v57  ;;  %v2596_v12 = vld [vmem:[#allocation21_spill] sm:$0xff] }
 0x28a   : > { %v1098_v33 = vmul.f32 %v1085_v24, %v2572_v52  ;;  %v1102_v25 = vmul.f32 %v1085_v24, %v2573_v49  ;;  %v1106_v35 = vmul.f32 %v1085_v24, %v2574_v58  ;;  %1225 = vst [vmem:[%s2236_s24 + $0x100] sm:$0xff] %v1177_v41  ;;  %1229 = vst [vmem:[%s2236_s24 + $0x120] sm:$0xff] %v1181_v7 }
 0x28b   : > { %v1110_v5 = vmul.f32 %v1085_v24, %v2575_v44  ;;  %1233 = vst [vmem:[%s2236_s24 + $0x140] sm:$0xff] %v1185_v2  ;;  %1237 = vst [vmem:[%s2236_s24 + $0x160] sm:$0xff] %v1189_v10  ;;  %v1114_v36 = vmul.f32 %v1085_v24, %v2576_v29  ;;  %v1118_v50 = vmul.f32 %v1085_v24, %v2577_v9  ;;  %v2598_v2 = vld [vmem:[#allocation26_spill] sm:$0xff] }
 0x28c   : > { %v2578_v55 = vsub.f32 %v1877_v38, %v2180_v57  ;;  %v2579_v47 = vsub.f32 %v1911_v56, %v2180_v57  ;;  %v2580_v11 = vsub.f32 %v1942_v13, %v2180_v57  ;;  %v2581_v18 = vsub.f32 %v1970_v43, %v2180_v57  ;;  %v1095_v43 = vpop.permute.xlu1 %1094 }
 0x28d   : > { %v2582_v53 = vsub.f32 %v2000_v14, %v2180_v57  ;;  %v2583_v38 = vsub.f32 %v2534_v16, %v2180_v57  ;;  %v1146_v56 = vmax.f32 %v1098_v33, 0.0  ;;  %v1150_v63 = vmax.f32 %v1102_v25, 0.0  ;;  %v2600_v33 = vld [vmem:[#allocation31_spill] sm:$0xff] }
 0x28e   : > { %v1122_v8 = vmul.f32 %v1085_v24, %v2578_v55  ;;  %v1126_v27 = vmul.f32 %v1085_v24, %v2579_v47  ;;  %v1130_v19 = vmul.f32 %v1085_v24, %v2580_v11  ;;  %v1134_v28 = vmul.f32 %v1085_v24, %v2581_v18 }
 0x28f   : > { %v1138_v59 = vmul.f32 %v1085_v24, %v2582_v53  ;;  %v1142_v62 = vmul.f32 %v1085_v24, %v2583_v38  ;;  %v1154_v13 = vmax.f32 %v1106_v35, 0.0  ;;  %v1158_v39 = vmax.f32 %v1110_v5, 0.0  ;;  %1194 = vst [vmem:[%s2236_s24 + $0x8] sm:$0xff] %v1146_v56  ;;  %1198 = vst [vmem:[%s2236_s24 + $0x28] sm:$0xff] %v1150_v63  ;;  %v2592_v24 = vld [vmem:[#allocation11_spill] sm:$0xff] }
 0x290   : > { %v1162_v15 = vmax.f32 %v1114_v36, 0.0  ;;  %v1166_v14 = vmax.f32 %v1118_v50, 0.0  ;;  %v1170_v23 = vmax.f32 %v1122_v8, 0.0  ;;  %v1174_v31 = vmax.f32 %v1126_v27, 0.0 }
 0x291   : > { %v1178_v40 = vmax.f32 %v1130_v19, 0.0  ;;  %v1182_v16 = vmax.f32 %v1134_v28, 0.0  ;;  %v1186_v57 = vmax.f32 %v1138_v59, 0.0  ;;  %v1190_v21 = vmax.f32 %v1142_v62, 0.0  ;;  %1202 = vst [vmem:[%s2236_s24 + $0x48] sm:$0xff] %v1154_v13  ;;  %1206 = vst [vmem:[%s2236_s24 + $0x68] sm:$0xff] %v1158_v39 }
 0x292   : > { %1210 = vst [vmem:[%s2236_s24 + $0x88] sm:$0xff] %v1162_v15  ;;  %1214 = vst [vmem:[%s2236_s24 + $0xa8] sm:$0xff] %v1166_v14  ;;  %v2584_v0 = vsub.f32 %v2549_v61, %v2128_v48  ;;  %v2585_v20 = vsub.f32 %v2550_v30, %v2128_v48  ;;  %v2586_v54 = vsub.f32 %v2551_v6, %v2128_v48 }
 0x293   : > { %1218 = vst [vmem:[%s2236_s24 + $0xc8] sm:$0xff] %v1170_v23  ;;  %1222 = vst [vmem:[%s2236_s24 + $0xe8] sm:$0xff] %v1174_v31  ;;  %v2587_v34 = vsub.f32 %v2552_v51, %v2128_v48  ;;  %v2589_v61 = vsub.f32 %v2588_v45, %v2128_v48  ;;  %v2591_v30 = vsub.f32 %v2590_v4, %v2128_v48 }
 0x294   : > { %v1100_v26 = vmul.f32 %v1095_v43, %v2584_v0  ;;  %v1104_v17 = vmul.f32 %v1095_v43, %v2585_v20  ;;  %v1108_v46 = vmul.f32 %v1095_v43, %v2586_v54  ;;  %1226 = vst [vmem:[%s2236_s24 + $0x108] sm:$0xff] %v1178_v40  ;;  %1230 = vst [vmem:[%s2236_s24 + $0x128] sm:$0xff] %v1182_v16 }
 0x295   : > { %v1112_v42 = vmul.f32 %v1095_v43, %v2587_v34  ;;  %1234 = vst [vmem:[%s2236_s24 + $0x148] sm:$0xff] %v1186_v57  ;;  %1238 = vst [vmem:[%s2236_s24 + $0x168] sm:$0xff] %v1190_v21  ;;  %v1116_v1 = vmul.f32 %v1095_v43, %v2589_v61  ;;  %v1120_v37 = vmul.f32 %v1095_v43, %v2591_v30 }
 0x296   : > { %v2593_v6 = vsub.f32 %v2592_v24, %v2128_v48  ;;  %v2595_v51 = vsub.f32 %v2594_v60, %v2128_v48  ;;  %v2597_v41 = vsub.f32 %v2596_v12, %v2128_v48  ;;  %v2599_v10 = vsub.f32 %v2598_v2, %v2128_v48 }
 0x297   : > { %v2601_v49 = vsub.f32 %v2600_v33, %v2128_v48  ;;  %v2602_v58 = vsub.f32 %v2069_v3, %v2128_v48  ;;  %v1148_v44 = vmax.f32 %v1100_v26, 0.0  ;;  %v1152_v5 = vmax.f32 %v1104_v17, 0.0 }
 0x298   : > { %v1124_v22 = vmul.f32 %v1095_v43, %v2593_v6  ;;  %v1128_v32 = vmul.f32 %v1095_v43, %v2595_v51  ;;  %v1132_v7 = vmul.f32 %v1095_v43, %v2597_v41  ;;  %v1136_v52 = vmul.f32 %v1095_v43, %v2599_v10 }
 0x299   : > { %v1140_v25 = vmul.f32 %v1095_v43, %v2601_v49  ;;  %v1144_v35 = vmul.f32 %v1095_v43, %v2602_v58  ;;  %v1156_v29 = vmax.f32 %v1108_v46, 0.0  ;;  %v1160_v36 = vmax.f32 %v1112_v42, 0.0  ;;  %1196 = vst [vmem:[%s2236_s24 + $0x18] sm:$0xff] %v1148_v44  ;;  %1200 = vst [vmem:[%s2236_s24 + $0x38] sm:$0xff] %v1152_v5 }
 0x29a   : > { %v1164_v9 = vmax.f32 %v1116_v1, 0.0  ;;  %v1168_v50 = vmax.f32 %v1120_v37, 0.0  ;;  %v1172_v55 = vmax.f32 %v1124_v22, 0.0  ;;  %v1176_v8 = vmax.f32 %v1128_v32, 0.0 }
 0x29b   : > { %v1180_v3 = vmax.f32 %v1132_v7, 0.0  ;;  %v1184_v48 = vmax.f32 %v1136_v52, 0.0  ;;  %v1188_v47 = vmax.f32 %v1140_v25, 0.0  ;;  %v1192_v27 = vmax.f32 %v1144_v35, 0.0  ;;  %1204 = vst [vmem:[%s2236_s24 + $0x58] sm:$0xff] %v1156_v29  ;;  %1208 = vst [vmem:[%s2236_s24 + $0x78] sm:$0xff] %v1160_v36 }
 0x29c   : > { %1212 = vst [vmem:[%s2236_s24 + $0x98] sm:$0xff] %v1164_v9  ;;  %1216 = vst [vmem:[%s2236_s24 + $0xb8] sm:$0xff] %v1168_v50 }
 0x29d   : > { %1220 = vst [vmem:[%s2236_s24 + $0xd8] sm:$0xff] %v1172_v55  ;;  %1224 = vst [vmem:[%s2236_s24 + $0xf8] sm:$0xff] %v1176_v8 }
 0x29e   : > { %1228 = vst [vmem:[%s2236_s24 + $0x118] sm:$0xff] %v1180_v3  ;;  %1232 = vst [vmem:[%s2236_s24 + $0x138] sm:$0xff] %v1184_v48 }
 0x29f   : > { %1236 = vst [vmem:[%s2236_s24 + $0x158] sm:$0xff] %v1188_v47  ;;  %1240 = vst [vmem:[%s2236_s24 + $0x178] sm:$0xff] %v1192_v27 }
 0x2a0   : > { %1612 = shalt.err (!%p1609_p5)
}
 0x2a1   : > { %s1613_s6 = scalar_lea.hbm %s2387_s28, 6144  ;;  %s1617_s15 = scalar_lea.hbm %s2453_s2, 12288 }
 0x2a2   : > { %p1614_p6 = scmp.ne.s32.totalorder %s2387_s28, %s1613_s6  ;;  %p1618_p10 = scmp.lt.u32.totalorder %s2387_s28, %s2453_s2 }
 0x2a3   : > { %p1619_p11 = scmp.lt.u32.totalorder %s1617_s15, %s1613_s6  ;;  %p1621_p13 = scmp.lt.u32.totalorder %s1613_s6, %s2387_s28 }
 0x2a4   : > { %p1615_p7 = pnand %p1614_p6, %p1739_p4 }
 0x2a5   : > { %p1620_p12 = por %p1619_p11, %p1618_p10 }
 0x2a6   : > { %p1616_p9 = pneg %p1615_p7 }
 0x2a7   : > { %p1622_p0 = por %p1621_p13, %p1620_p12 }
 0x2a9   : > { %p1623_p1 = pnand %p1622_p0, %p1616_p9 }
 0x2ab   : > { %1626 = shalt.err (!%p1623_p1)
}
 0x2ac   : > { %s1682_s20 = smov 128   ;;  %s1683_s23 = smov 8  }
 0x2ad   : > { %1500 = dma.vmem_to_hbm [thread:$0]  (%p1739_p4), %s2389_s12, 6144, %s2387_s28, %s2405_s29, %s1682_s20, %s1682_s20, %s1683_s23  }
 0x2ae PF: > { %p1506_p2 = scmp.ge.s32.totalorder %s1677_s14, 2  ;;  %s1270_s24 = sand.u32 1, %s1657_s9  }
 0x2af   : > { %s1271_s25 = scalar_lea.sflag [#allocation5], %s1270_s24 }
 0x2b0   : > { %p1503_p3 = pnand %p1506_p2, %p1746_p8 }
 0x2b2   : > { %1652 = dma.done.wait (!%p1503_p3), %s1271_s25, 6144  }
 0x2b3   : > { %1654 = vsyncadd (!%p1503_p3), %s1271_s25, 4294961152  ;;  %s15_s14 = sadd.s32 1, %s1677_s14   ;;  %s2603_s9 = smov %s1661_s10 }
 0x2b4   : > { %p12_p5 = scmp.ge.s32.totalorder %s15_s14, 4   ;;  %s2604_s10 = smov %s1665_s11 }
 0x2b5   : > { %s2605_s11 = smov %s1752_s22  ;;  %s2606_s12 = smov %s1673_s13 }
 0x2b6   : > { %s2607_s13 = smov %s2609_s17  ;;  %14 = sbr.rel (!%p12_p5) target bundleno = 4 (0x4), region = 72 }
 0x2bd   :  { %1276 = vsyncpa [#allocation5], 1 }
 0x2be   :  { %1278 = vsyncpa [#allocation5 + $0x1], 1 }

</bundles_post_ra>
